<compile_context>
chip_gen: v7x
topology: tpu7x:2x2x1
jax: 0.10.0
libtpu: 0.0.40
codegen_flags: <defaults>
</compile_context>

<pallas_src>
import numpy as np
import jax
import jax.numpy as jnp
from jax.experimental import pallas as pl
from jax.experimental.pallas import tpu as pltpu


# ----------------------------------------------------------------------------
# Host-side (NumPy) index preprocessing — faithful ports of the torch helpers.
# Dynamic-shape loops (surface_knn / farthest_point_sample) stay as host glue.
# ----------------------------------------------------------------------------
def index_points_np(points, idx):
    B = points.shape[0]
    batch = np.arange(B).reshape((B,) + (1,) * (idx.ndim - 1))
    return points[batch, idx]


def get_neighbor_index_np(vertices, neighbor_num, is_backdis=False):
    inner = np.matmul(vertices, np.transpose(vertices, (0, 2, 1)))       # (B,N,N)
    quadratic = np.sum(vertices ** 2, axis=2)                            # (B,N)
    distance = inner * -2 + quadratic[:, None, :] + quadratic[:, :, None]
    order = np.argsort(distance, axis=-1, kind="stable")
    neighbor_index = order[..., : neighbor_num + 1][..., 1:]             # drop self
    if is_backdis:
        return neighbor_index, distance
    return neighbor_index


def indexes_val_np(vals, inds):
    return np.take_along_axis(vals, inds, axis=-1)


def surface_knn_np(points_all, k_near=100, n_stepk=10):
    ind_neighbor_all, all_dist = get_neighbor_index_np(points_all, n_stepk, True)
    neighbor_index_max = np.argmax(all_dist, axis=-1)[..., None]
    new_neighinds = ind_neighbor_all.copy()
    num_ita = 0
    while True:
        n_current_neighbors = new_neighinds.shape[-1]
        indexed_all = []
        for j in range(n_current_neighbors):
            indexed_all.append(index_points_np(ind_neighbor_all, new_neighinds[:, :, j]))
        new_neighinds = np.concatenate(indexed_all, axis=-1)
        new_neighinds = np.sort(new_neighinds, axis=-1)
        duplicates = np.zeros_like(new_neighinds)
        duplicates[:, :, 1:] = new_neighinds[:, :, 1:] == new_neighinds[:, :, :-1]
        neighbor_index_max2 = np.repeat(neighbor_index_max, new_neighinds.shape[-1], axis=-1)
        mask = duplicates.astype(bool)
        new_neighinds[mask] = neighbor_index_max2[mask]
        dist_neighinds = indexes_val_np(all_dist, new_neighinds)
        sort_dist = np.sort(dist_neighinds, axis=-1)
        sort_dist_maxind = np.argmax(sort_dist, axis=-1)
        valid_nnear = int(sort_dist_maxind.min()) + 1
        is_end_loop = False
        if valid_nnear >= k_near + 1:
            valid_nnear = k_near + 1
            is_end_loop = True
        sub_neighbor_index = np.argsort(dist_neighinds, axis=-1, kind="stable")[..., :valid_nnear]
        new_neighinds = indexes_val_np(new_neighinds, sub_neighbor_index)
        new_neighinds = new_neighinds[:, :, 1:]
        if is_end_loop:
            break
        num_ita += 1
        if num_ita > 20:
            return ind_neighbor_all          # same bail-out as the torch code
    return new_neighinds


def farthest_point_sample_np(xyz, n_samples):
    # TODO(synk): torch starts from torch.randint(...); the deterministic start
    #             (index 0) is one valid realization of the same algorithm.
    B, N, _ = xyz.shape
    centroids = np.zeros((B, n_samples), dtype=np.int64)
    distance = np.full((B, N), 1e10, dtype=np.float32)
    farthest = np.zeros((B,), dtype=np.int64)
    batch_indices = np.arange(B)
    for i in range(n_samples):
        centroids[:, i] = farthest
        centroid = xyz[batch_indices, farthest, :].reshape(B, 1, 3)
        dist = np.sum((xyz - centroid) ** 2, -1)
        mask = dist < distance
        distance[mask] = dist[mask].astype(np.float32)
        farthest = np.argmax(distance, -1)
    return centroids


# ----------------------------------------------------------------------------
# Sample-and-group, channels-first (slab built directly in kernel layout).
# ----------------------------------------------------------------------------
def build_group_slab(xyz_cf, fea_cf, n_center, n_near, n_stepk=10):
    """xyz_cf (B,3,N), fea_cf (B,C,N)|None -> new_xyz_cf (B,3,S), slab (B,K,3+C,S)."""
    xyz_ln = jnp.transpose(xyz_cf, (0, 2, 1))                     # (B,N,3)
    xyz_np = np.asarray(xyz_ln, dtype=np.float32)
    idx_all = surface_knn_np(xyz_np, n_near, n_stepk)             # (B,N,K)
    if n_center is None:
        new_xyz_cf = xyz_cf
        idx_np = idx_all
    else:
        fps_idx = farthest_point_sample_np(xyz_np, n_center)      # (B,S)
        fps = jnp.asarray(fps_idx, dtype=jnp.int32)
        new_xyz_cf = jnp.take_along_axis(xyz_cf, fps[:, None, :], axis=-1)      # (B,3,S)
        idx_np = index_points_np(idx_all, fps_idx)                # (B,S,K)
    idx = jnp.asarray(idx_np, dtype=jnp.int32)                    # (B,S,K)
    idx_kf = jnp.transpose(idx, (0, 2, 1))[:, :, None, :]         # (B,K,1,S)
    gxyz = jnp.take_along_axis(xyz_cf[:, None, :, :], idx_kf, axis=-1)          # (B,K,3,S)
    gxyz = gxyz - new_xyz_cf[:, None, :, :]                       # center-relative
    if fea_cf is not None:
        gfea = jnp.take_along_axis(fea_cf[:, None, :, :], idx_kf, axis=-1)      # (B,K,C,S)
        slab = jnp.concatenate([gxyz, gfea], axis=2)
    else:
        slab = gxyz
    return new_xyz_cf, slab.astype(jnp.float32)


# ----------------------------------------------------------------------------
# Parameter folding / packing (eval-mode BN folded into the 1x1 convs).
# ----------------------------------------------------------------------------
def fold_bn_params(layers, bn_eps=1e-5):
    ws, bs = [], []
    for (W, b, g, beta, mean, var) in layers:           # W: (cin, cout)
        scale = g / jnp.sqrt(var + bn_eps)
        ws.append(jnp.transpose(W * scale[None, :]))    # (cout, cin) channels-first
        bs.append((b - mean) * scale + beta)            # (cout,)
    return ws, bs


def pack_params(ws, bs):
    """Pack all layers into one zero-padded (L,Cmax,Cmax) weight + (L,Cmax,1) bias slab."""
    L = len(ws)
    cmax = max(max(int(w.shape[0]), int(w.shape[1])) for w in ws)
    wslab = jnp.zeros((L, cmax, cmax), jnp.float32)
    bslab = jnp.zeros((L, cmax, 1), jnp.float32)
    dims = []
    for i, (w, b) in enumerate(zip(ws, bs)):
        co, ci = int(w.shape[0]), int(w.shape[1])
        wslab = wslab.at[i, :co, :ci].set(w)
        bslab = bslab.at[i, :co, 0].set(b)
        dims.append((ci, co))
    return wslab, bslab, tuple(dims)


# ----------------------------------------------------------------------------
# Pallas kernel: fused point-wise MLP (BN folded) + max over K neighbors.
# ----------------------------------------------------------------------------
def _make_sa_mlp_kernel(bb, K, layer_dims):
    L = len(layer_dims)

    def kernel(x_ref, w_ref, b_ref, o_ref):
        # x_ref: (bb, K, Cin, tS)   w_ref: (L, Cmax, Cmax)   b_ref: (L, Cmax, 1)
        # o_ref: (bb, Cout, tS)
        # Hoist the tiny folded weights once per grid step; cast once to bf16.
        Ws = [w_ref[li, :co, :ci].astype(jnp.bfloat16)
              for li, (ci, co) in enumerate(layer_dims)]
        Bs = [b_ref[li, :co, :] for li, (ci, co) in enumerate(layer_dims)]
        for bi in range(bb):
            acc = None
            for k in range(K):
                h = x_ref[bi, k]                          # (Cin, tS) f32, lane-dense
                for li in range(L):
                    # bf16 MXU matmul with f32 accumulate; bias+ReLU in f32.
                    h = jnp.dot(Ws[li], h.astype(jnp.bfloat16),
                                preferred_element_type=jnp.float32)
                    h = jnp.maximum(h + Bs[li], 0.0)
                acc = h if acc is None else jnp.maximum(acc, h)   # running K-max
            o_ref[bi] = acc.astype(o_ref.dtype)

    return kernel


def _ceil_to(x, m):
    return ((x + m - 1) // m) * m


def _step_bytes(bb, tS, K, Cin, cmax, out_c):
    """Per-grid-step VMEM estimate: lane/sublane padded, double-buffered I/O."""
    lanes = _ceil_to(tS, 128)
    in_blk = bb * K * _ceil_to(Cin, 8) * lanes * 4
    out_blk = bb * _ceil_to(out_c, 8) * lanes * 4
    act = (2 * _ceil_to(cmax, 8) + _ceil_to(out_c, 8)) * lanes * 4
    return 2 * in_blk + 2 * out_blk + act


def _vmem_capacity_bytes():
    try:
        cap = getattr(pltpu.get_tpu_info(), "vmem_capacity_bytes", None)
        if cap:
            return int(cap)
    except Exception:
        pass
    return 64 << 20                      # v7x per-TC floor — safe everywhere


def _select_tiles(B, S, K, Cin, cmax, out_c, budget):
    if S % 128 == 0:
        s_cands = sorted({t for t in (S, 2048, 1024, 512, 256, 128)
                          if t <= S and S % t == 0}, reverse=True)
    else:
        s_cands = [S]                    # (8,128) rule: non-multiples must be full-dim
    b_cands = [d for d in range(B, 0, -1) if B % d == 0]
    fitting = [(bb, tS) for tS in s_cands for bb in b_cands
               if _step_bytes(bb, tS, K, Cin, cmax, out_c) <= budget]
    if not fitting:
        return 1, s_cands[-1]
    multi = [(bb, tS) for (bb, tS) in fitting if (B // bb) * (S // tS) >= 2]
    pool = multi if multi else fitting   # prefer >=2 parallel steps (v7x 2 TCs)
    return max(pool, key=lambda c: _step_bytes(c[0], c[1], K, Cin, cmax, out_c))


def sa_mlp_maxpool_pallas(slab, wslab, bslab, layer_dims):
    """slab (B,K,Cin,S) -> (B,Cout,S): relu(W@x+b) per layer, max over K."""
    B, K, Cin, S = slab.shape
    out_c = layer_dims[-1][1]
    cmax = int(wslab.shape[1])

    vmem_cap = _vmem_capacity_bytes()
    budget = min(vmem_cap // 2, 48 << 20)            # headroom for compiler scratch
    bb, tS = _select_tiles(B, S, K, Cin, cmax, out_c, budget)
    vmem_limit = int(min(vmem_cap,
                         max(32 << 20, 2 * _step_bytes(bb, tS, K, Cin, cmax, out_c))))

    kernel = _make_sa_mlp_kernel(bb, K, layer_dims)
    flops = 2 * B * S * K * sum(ci * co for ci, co in layer_dims)
    bytes_accessed = 4 * (slab.size + wslab.size + bslab.size + B * S * out_c)

    return pl.pallas_call(
        kernel,
        out_shape=jax.ShapeDtypeStruct((B, out_c, S), jnp.float32),
        grid=(B // bb, S // tS),
        in_specs=[
            pl.BlockSpec((bb, K, Cin, tS), lambda bi, si: (bi, 0, 0, si)),
            pl.BlockSpec(wslab.shape, lambda bi, si: (0, 0, 0)),   # resident params
            pl.BlockSpec(bslab.shape, lambda bi, si: (0, 0, 0)),
        ],
        out_specs=pl.BlockSpec((bb, out_c, tS), lambda bi, si: (bi, 0, si)),
        compiler_params=pltpu.CompilerParams(
            dimension_semantics=("parallel", "parallel"),
            vmem_limit_bytes=vmem_limit),
        cost_estimate=pl.CostEstimate(flops=int(flops), transcendentals=0,
                                      bytes_accessed=int(bytes_accessed)),
    )(slab, wslab, bslab)


# ----------------------------------------------------------------------------
# Full SA_Scratch forward.
# ----------------------------------------------------------------------------
def sa_scratch_forward(xyz_cf, fea_cf, params, n_center, n_near, bn_eps=1e-5):
    """Returns (new_xyz (B,3,S), new_fea (B,mlp[-1],S)) like the torch module."""
    new_xyz_cf, slab = build_group_slab(xyz_cf, fea_cf, n_center, n_near)
    ws, bs = fold_bn_params(params["layers"], bn_eps)
    wslab, bslab, dims = pack_params(ws, bs)
    pooled = sa_mlp_maxpool_pallas(slab, wslab, bslab, dims)       # (B,Cout,S)
    return new_xyz_cf, pooled


# ----------------------------------------------------------------------------
# Pure-JAX reference (un-folded BN, f32) for the Pallas hot path.
# ----------------------------------------------------------------------------
def reference_mlp_maxpool(slab, params, bn_eps=1e-5):
    x = slab                                                       # (B,K,Cin,S)
    for (W, b, g, beta, mean, var) in params["layers"]:            # W: (cin,cout)
        x = jnp.einsum("bkcs,cd->bkds", x, W) + b[None, None, :, None]
        x = (x - mean[None, None, :, None]) / jnp.sqrt(var[None, None, :, None] + bn_eps)
        x = x * g[None, None, :, None] + beta[None, None, :, None]
        x = jnp.maximum(x, 0.0)
    return jnp.max(x, axis=1)                                      # (B,Cout,S)


def init_params(key, in_channel, mlp):
    layers = []
    last = in_channel
    keys = jax.random.split(key, 6 * len(mlp))
    ki = iter(keys)
    for out_c in mlp:
        W = 0.1 * jax.random.normal(next(ki), (last, out_c), jnp.float32)
        b = 0.1 * jax.random.normal(next(ki), (out_c,), jnp.float32)
        g = 1.0 + 0.1 * jax.random.normal(next(ki), (out_c,), jnp.float32)
        beta = 0.1 * jax.random.normal(next(ki), (out_c,), jnp.float32)
        mean = 0.1 * jax.random.normal(next(ki), (out_c,), jnp.float32)
        var = 1.0 + 0.1 * jnp.abs(jax.random.normal(next(ki), (out_c,), jnp.float32))
        layers.append((W, b, g, beta, mean, var))
        last = out_c
    return {"layers": layers}


if __name__ == "__main__":
    B, N, C_fea = 2, 16, 8
    n_center, n_near = 8, 4
    mlp = [32, 32, 24]
    in_channel = C_fea + 3                      # 3 xyz-offset channels + features

    key = jax.random.PRNGKey(0)
    k_xyz, k_fea, k_par = jax.random.split(key, 3)
    xyz_cf = jax.random.normal(k_xyz, (B, 3, N), jnp.float32)      # channels-first
    fea_cf = jax.random.normal(k_fea, (B, C_fea, N), jnp.float32)
    params = init_params(k_par, in_channel, mlp)

    new_xyz, new_fea = sa_scratch_forward(xyz_cf, fea_cf, params, n_center, n_near)
    jax.block_until_ready(new_fea)
    assert new_xyz.shape == (B, 3, n_center)
    assert new_fea.shape == (B, mlp[-1], n_center)

    # Correctness of the Pallas hot path (bf16 MXU matmuls, f32 accumulate)
    # against the pure-JAX f32 reference with un-folded BatchNorm.
    _, slab = build_group_slab(xyz_cf, fea_cf, n_center, n_near)
    ws, bs = fold_bn_params(params["layers"])
    wslab, bslab, dims = pack_params(ws, bs)
    got = sa_mlp_maxpool_pallas(slab, wslab, bslab, dims)
    ref = reference_mlp_maxpool(slab, params)
    np.testing.assert_allclose(np.asarray(got), np.asarray(ref), atol=5e-2, rtol=5e-2)
    np.testing.assert_allclose(np.asarray(new_fea), np.asarray(ref), atol=5e-2, rtol=5e-2)

    print("KERNEL_OK")
</pallas_src>

<mosaic_0001>
module attributes {stable_mosaic.version = 11 : i64} {
  func.func @kernel(%arg0: i32, %arg1: i32, %arg2: memref<1x4x11x8xf32, #tpu.memory_space<vmem>>, %arg3: memref<3x32x32xf32, #tpu.memory_space<vmem>>, %arg4: memref<3x32x1xf32, #tpu.memory_space<vmem>>, %arg5: memref<1x24x8xf32, #tpu.memory_space<vmem>>) attributes {dimension_semantics = [#tpu.dimension_semantics<parallel>, #tpu.dimension_semantics<parallel>], iteration_bounds = array<i64: 2, 1>, scalar_prefetch = 0 : i64, scratch_operands = 0 : i64, tpu.core_type = #tpu.core_type<tc>, window_params = [{transform_indices = @transform_0, window_bounds = array<i64: 1, 4, 11, 8>}, {pipeline_mode = #tpu.pipeline_mode<synchronous>, transform_indices = @transform_1, window_bounds = array<i64: 3, 32, 32>}, {pipeline_mode = #tpu.pipeline_mode<synchronous>, transform_indices = @transform_2, window_bounds = array<i64: 3, 32, 1>}, {transform_indices = @transform_3, window_bounds = array<i64: 1, 24, 8>}]} {
    %c0 = arith.constant 0 : index
    %c0_0 = arith.constant 0 : index
    %c0_1 = arith.constant 0 : index
    %0 = vector.load %arg3[%c0, %c0_0, %c0_1] : memref<3x32x32xf32, #tpu.memory_space<vmem>>, vector<1x32x11xf32>
    %1 = vector.shape_cast %0 : vector<1x32x11xf32> to vector<32x11xf32>
    %2 = arith.truncf %1 : vector<32x11xf32> to vector<32x11xbf16>
    %c1 = arith.constant 1 : index
    %c0_2 = arith.constant 0 : index
    %c0_3 = arith.constant 0 : index
    %3 = vector.load %arg3[%c1, %c0_2, %c0_3] : memref<3x32x32xf32, #tpu.memory_space<vmem>>, vector<1x32x32xf32>
    %4 = vector.shape_cast %3 : vector<1x32x32xf32> to vector<32x32xf32>
    %5 = arith.truncf %4 : vector<32x32xf32> to vector<32x32xbf16>
    %c2 = arith.constant 2 : index
    %c0_4 = arith.constant 0 : index
    %c0_5 = arith.constant 0 : index
    %6 = vector.load %arg3[%c2, %c0_4, %c0_5] : memref<3x32x32xf32, #tpu.memory_space<vmem>>, vector<1x24x32xf32>
    %7 = vector.shape_cast %6 : vector<1x24x32xf32> to vector<24x32xf32>
    %8 = arith.truncf %7 : vector<24x32xf32> to vector<24x32xbf16>
    %c0_6 = arith.constant 0 : index
    %c0_7 = arith.constant 0 : index
    %c0_8 = arith.constant 0 : index
    %9 = vector.load %arg4[%c0_6, %c0_7, %c0_8] : memref<3x32x1xf32, #tpu.memory_space<vmem>>, vector<1x32x1xf32>
    %10 = vector.shape_cast %9 : vector<1x32x1xf32> to vector<32x1xf32>
    %c1_9 = arith.constant 1 : index
    %c0_10 = arith.constant 0 : index
    %c0_11 = arith.constant 0 : index
    %11 = vector.load %arg4[%c1_9, %c0_10, %c0_11] : memref<3x32x1xf32, #tpu.memory_space<vmem>>, vector<1x32x1xf32>
    %12 = vector.shape_cast %11 : vector<1x32x1xf32> to vector<32x1xf32>
    %c2_12 = arith.constant 2 : index
    %c0_13 = arith.constant 0 : index
    %c0_14 = arith.constant 0 : index
    %13 = vector.load %arg4[%c2_12, %c0_13, %c0_14] : memref<3x32x1xf32, #tpu.memory_space<vmem>>, vector<1x24x1xf32>
    %14 = vector.shape_cast %13 : vector<1x24x1xf32> to vector<24x1xf32>
    %c0_15 = arith.constant 0 : index
    %c0_16 = arith.constant 0 : index
    %c0_17 = arith.constant 0 : index
    %c0_18 = arith.constant 0 : index
    %15 = vector.load %arg2[%c0_15, %c0_16, %c0_17, %c0_18] : memref<1x4x11x8xf32, #tpu.memory_space<vmem>>, vector<1x1x11x8xf32>
    %16 = vector.shape_cast %15 : vector<1x1x11x8xf32> to vector<11x8xf32>
    %17 = arith.truncf %16 : vector<11x8xf32> to vector<11x8xbf16>
    %cst = arith.constant dense<0.000000e+00> : vector<32x8xf32>
    %18 = tpu.matmul %2, %17, %cst {dimension_numbers = #tpu.dot_dimension_numbers<[1], [0], [0], [1], [0, 0, 1, 1], [], []>} : vector<32x11xbf16>, vector<11x8xbf16>, vector<32x8xf32> -> vector<32x8xf32>
    %19 = vector.broadcast %10 : vector<32x1xf32> to vector<32x8xf32>
    %20 = arith.addf %18, %19 : vector<32x8xf32>
    %cst_19 = arith.constant 0.000000e+00 : f32
    %21 = vector.broadcast %cst_19 : f32 to vector<32x8xf32>
    %22 = arith.maximumf %20, %21 : vector<32x8xf32>
    %23 = arith.truncf %22 : vector<32x8xf32> to vector<32x8xbf16>
    %cst_20 = arith.constant dense<0.000000e+00> : vector<32x8xf32>
    %24 = tpu.matmul %5, %23, %cst_20 {dimension_numbers = #tpu.dot_dimension_numbers<[1], [0], [0], [1], [0, 0, 1, 1], [], []>} : vector<32x32xbf16>, vector<32x8xbf16>, vector<32x8xf32> -> vector<32x8xf32>
    %25 = vector.broadcast %12 : vector<32x1xf32> to vector<32x8xf32>
    %26 = arith.addf %24, %25 : vector<32x8xf32>
    %cst_21 = arith.constant 0.000000e+00 : f32
    %27 = vector.broadcast %cst_21 : f32 to vector<32x8xf32>
    %28 = arith.maximumf %26, %27 : vector<32x8xf32>
    %29 = arith.truncf %28 : vector<32x8xf32> to vector<32x8xbf16>
    %cst_22 = arith.constant dense<0.000000e+00> : vector<24x8xf32>
    %30 = tpu.matmul %8, %29, %cst_22 {dimension_numbers = #tpu.dot_dimension_numbers<[1], [0], [0], [1], [0, 0, 1, 1], [], []>} : vector<24x32xbf16>, vector<32x8xbf16>, vector<24x8xf32> -> vector<24x8xf32>
    %31 = vector.broadcast %14 : vector<24x1xf32> to vector<24x8xf32>
    %32 = arith.addf %30, %31 : vector<24x8xf32>
    %cst_23 = arith.constant 0.000000e+00 : f32
    %33 = vector.broadcast %cst_23 : f32 to vector<24x8xf32>
    %34 = arith.maximumf %32, %33 : vector<24x8xf32>
    %c0_24 = arith.constant 0 : index
    %c1_25 = arith.constant 1 : index
    %c0_26 = arith.constant 0 : index
    %c0_27 = arith.constant 0 : index
    %35 = vector.load %arg2[%c0_24, %c1_25, %c0_26, %c0_27] : memref<1x4x11x8xf32, #tpu.memory_space<vmem>>, vector<1x1x11x8xf32>
    %36 = vector.shape_cast %35 : vector<1x1x11x8xf32> to vector<11x8xf32>
    %37 = arith.truncf %36 : vector<11x8xf32> to vector<11x8xbf16>
    %cst_28 = arith.constant dense<0.000000e+00> : vector<32x8xf32>
    %38 = tpu.matmul %2, %37, %cst_28 {dimension_numbers = #tpu.dot_dimension_numbers<[1], [0], [0], [1], [0, 0, 1, 1], [], []>} : vector<32x11xbf16>, vector<11x8xbf16>, vector<32x8xf32> -> vector<32x8xf32>
    %39 = vector.broadcast %10 : vector<32x1xf32> to vector<32x8xf32>
    %40 = arith.addf %38, %39 : vector<32x8xf32>
    %cst_29 = arith.constant 0.000000e+00 : f32
    %41 = vector.broadcast %cst_29 : f32 to vector<32x8xf32>
    %42 = arith.maximumf %40, %41 : vector<32x8xf32>
    %43 = arith.truncf %42 : vector<32x8xf32> to vector<32x8xbf16>
    %cst_30 = arith.constant dense<0.000000e+00> : vector<32x8xf32>
    %44 = tpu.matmul %5, %43, %cst_30 {dimension_numbers = #tpu.dot_dimension_numbers<[1], [0], [0], [1], [0, 0, 1, 1], [], []>} : vector<32x32xbf16>, vector<32x8xbf16>, vector<32x8xf32> -> vector<32x8xf32>
    %45 = vector.broadcast %12 : vector<32x1xf32> to vector<32x8xf32>
    %46 = arith.addf %44, %45 : vector<32x8xf32>
    %cst_31 = arith.constant 0.000000e+00 : f32
    %47 = vector.broadcast %cst_31 : f32 to vector<32x8xf32>
    %48 = arith.maximumf %46, %47 : vector<32x8xf32>
    %49 = arith.truncf %48 : vector<32x8xf32> to vector<32x8xbf16>
    %cst_32 = arith.constant dense<0.000000e+00> : vector<24x8xf32>
    %50 = tpu.matmul %8, %49, %cst_32 {dimension_numbers = #tpu.dot_dimension_numbers<[1], [0], [0], [1], [0, 0, 1, 1], [], []>} : vector<24x32xbf16>, vector<32x8xbf16>, vector<24x8xf32> -> vector<24x8xf32>
    %51 = vector.broadcast %14 : vector<24x1xf32> to vector<24x8xf32>
    %52 = arith.addf %50, %51 : vector<24x8xf32>
    %cst_33 = arith.constant 0.000000e+00 : f32
    %53 = vector.broadcast %cst_33 : f32 to vector<24x8xf32>
    %54 = arith.maximumf %52, %53 : vector<24x8xf32>
    %55 = arith.maximumf %34, %54 : vector<24x8xf32>
    %c0_34 = arith.constant 0 : index
    %c2_35 = arith.constant 2 : index
    %c0_36 = arith.constant 0 : index
    %c0_37 = arith.constant 0 : index
    %56 = vector.load %arg2[%c0_34, %c2_35, %c0_36, %c0_37] : memref<1x4x11x8xf32, #tpu.memory_space<vmem>>, vector<1x1x11x8xf32>
    %57 = vector.shape_cast %56 : vector<1x1x11x8xf32> to vector<11x8xf32>
    %58 = arith.truncf %57 : vector<11x8xf32> to vector<11x8xbf16>
    %cst_38 = arith.constant dense<0.000000e+00> : vector<32x8xf32>
    %59 = tpu.matmul %2, %58, %cst_38 {dimension_numbers = #tpu.dot_dimension_numbers<[1], [0], [0], [1], [0, 0, 1, 1], [], []>} : vector<32x11xbf16>, vector<11x8xbf16>, vector<32x8xf32> -> vector<32x8xf32>
    %60 = vector.broadcast %10 : vector<32x1xf32> to vector<32x8xf32>
    %61 = arith.addf %59, %60 : vector<32x8xf32>
    %cst_39 = arith.constant 0.000000e+00 : f32
    %62 = vector.broadcast %cst_39 : f32 to vector<32x8xf32>
    %63 = arith.maximumf %61, %62 : vector<32x8xf32>
    %64 = arith.truncf %63 : vector<32x8xf32> to vector<32x8xbf16>
    %cst_40 = arith.constant dense<0.000000e+00> : vector<32x8xf32>
    %65 = tpu.matmul %5, %64, %cst_40 {dimension_numbers = #tpu.dot_dimension_numbers<[1], [0], [0], [1], [0, 0, 1, 1], [], []>} : vector<32x32xbf16>, vector<32x8xbf16>, vector<32x8xf32> -> vector<32x8xf32>
    %66 = vector.broadcast %12 : vector<32x1xf32> to vector<32x8xf32>
    %67 = arith.addf %65, %66 : vector<32x8xf32>
    %cst_41 = arith.constant 0.000000e+00 : f32
    %68 = vector.broadcast %cst_41 : f32 to vector<32x8xf32>
    %69 = arith.maximumf %67, %68 : vector<32x8xf32>
    %70 = arith.truncf %69 : vector<32x8xf32> to vector<32x8xbf16>
    %cst_42 = arith.constant dense<0.000000e+00> : vector<24x8xf32>
    %71 = tpu.matmul %8, %70, %cst_42 {dimension_numbers = #tpu.dot_dimension_numbers<[1], [0], [0], [1], [0, 0, 1, 1], [], []>} : vector<24x32xbf16>, vector<32x8xbf16>, vector<24x8xf32> -> vector<24x8xf32>
    %72 = vector.broadcast %14 : vector<24x1xf32> to vector<24x8xf32>
    %73 = arith.addf %71, %72 : vector<24x8xf32>
    %cst_43 = arith.constant 0.000000e+00 : f32
    %74 = vector.broadcast %cst_43 : f32 to vector<24x8xf32>
    %75 = arith.maximumf %73, %74 : vector<24x8xf32>
    %76 = arith.maximumf %55, %75 : vector<24x8xf32>
    %c0_44 = arith.constant 0 : index
    %c3 = arith.constant 3 : index
    %c0_45 = arith.constant 0 : index
    %c0_46 = arith.constant 0 : index
    %77 = vector.load %arg2[%c0_44, %c3, %c0_45, %c0_46] : memref<1x4x11x8xf32, #tpu.memory_space<vmem>>, vector<1x1x11x8xf32>
    %78 = vector.shape_cast %77 : vector<1x1x11x8xf32> to vector<11x8xf32>
    %79 = arith.truncf %78 : vector<11x8xf32> to vector<11x8xbf16>
    %cst_47 = arith.constant dense<0.000000e+00> : vector<32x8xf32>
    %80 = tpu.matmul %2, %79, %cst_47 {dimension_numbers = #tpu.dot_dimension_numbers<[1], [0], [0], [1], [0, 0, 1, 1], [], []>} : vector<32x11xbf16>, vector<11x8xbf16>, vector<32x8xf32> -> vector<32x8xf32>
    %81 = vector.broadcast %10 : vector<32x1xf32> to vector<32x8xf32>
    %82 = arith.addf %80, %81 : vector<32x8xf32>
    %cst_48 = arith.constant 0.000000e+00 : f32
    %83 = vector.broadcast %cst_48 : f32 to vector<32x8xf32>
    %84 = arith.maximumf %82, %83 : vector<32x8xf32>
    %85 = arith.truncf %84 : vector<32x8xf32> to vector<32x8xbf16>
    %cst_49 = arith.constant dense<0.000000e+00> : vector<32x8xf32>
    %86 = tpu.matmul %5, %85, %cst_49 {dimension_numbers = #tpu.dot_dimension_numbers<[1], [0], [0], [1], [0, 0, 1, 1], [], []>} : vector<32x32xbf16>, vector<32x8xbf16>, vector<32x8xf32> -> vector<32x8xf32>
    %87 = vector.broadcast %12 : vector<32x1xf32> to vector<32x8xf32>
    %88 = arith.addf %86, %87 : vector<32x8xf32>
    %cst_50 = arith.constant 0.000000e+00 : f32
    %89 = vector.broadcast %cst_50 : f32 to vector<32x8xf32>
    %90 = arith.maximumf %88, %89 : vector<32x8xf32>
    %91 = arith.truncf %90 : vector<32x8xf32> to vector<32x8xbf16>
    %cst_51 = arith.constant dense<0.000000e+00> : vector<24x8xf32>
    %92 = tpu.matmul %8, %91, %cst_51 {dimension_numbers = #tpu.dot_dimension_numbers<[1], [0], [0], [1], [0, 0, 1, 1], [], []>} : vector<24x32xbf16>, vector<32x8xbf16>, vector<24x8xf32> -> vector<24x8xf32>
    %93 = vector.broadcast %14 : vector<24x1xf32> to vector<24x8xf32>
    %94 = arith.addf %92, %93 : vector<24x8xf32>
    %cst_52 = arith.constant 0.000000e+00 : f32
    %95 = vector.broadcast %cst_52 : f32 to vector<24x8xf32>
    %96 = arith.maximumf %94, %95 : vector<24x8xf32>
    %97 = arith.maximumf %76, %96 : vector<24x8xf32>
    %c0_53 = arith.constant 0 : index
    %c0_54 = arith.constant 0 : index
    %c0_55 = arith.constant 0 : index
    %98 = vector.load %arg5[%c0_53, %c0_54, %c0_55] : memref<1x24x8xf32, #tpu.memory_space<vmem>>, vector<1x24x8xf32>
    %99 = vector.shape_cast %98 : vector<1x24x8xf32> to vector<24x8xf32>
    %100 = vector.shape_cast %97 : vector<24x8xf32> to vector<1x24x8xf32>
    tpu.vector_store %arg5[%c0_53, %c0_54, %c0_55], %100 {strides = array<i32>} : memref<1x24x8xf32, #tpu.memory_space<vmem>>, vector<1x24x8xf32>,
    return
  }
  func.func @transform_0(%arg0: i32, %arg1: i32) -> (i32, i32, i32, i32) {
    %c0_i32 = arith.constant 0 : i32
    %c0_i32_0 = arith.constant 0 : i32
    %c0_i32_1 = arith.constant 0 : i32
    return %arg0, %c0_i32, %c0_i32_0, %arg1 : i32, i32, i32, i32
  }
  func.func @transform_1(%arg0: i32, %arg1: i32) -> (i32, i32, i32) {
    %c0_i32 = arith.constant 0 : i32
    %c0_i32_0 = arith.constant 0 : i32
    %c0_i32_1 = arith.constant 0 : i32
    %c0_i32_2 = arith.constant 0 : i32
    return %c0_i32, %c0_i32_0, %c0_i32_1 : i32, i32, i32
  }
  func.func @transform_2(%arg0: i32, %arg1: i32) -> (i32, i32, i32) {
    %c0_i32 = arith.constant 0 : i32
    %c0_i32_0 = arith.constant 0 : i32
    %c0_i32_1 = arith.constant 0 : i32
    %c0_i32_2 = arith.constant 0 : i32
    return %c0_i32, %c0_i32_0, %c0_i32_1 : i32, i32, i32
  }
  func.func @transform_3(%arg0: i32, %arg1: i32) -> (i32, i32, i32) {
    %c0_i32 = arith.constant 0 : i32
    %c0_i32_0 = arith.constant 0 : i32
    return %arg0, %c0_i32, %arg1 : i32, i32, i32
  }
}

</mosaic_0001>

<bundles_post_ra>
// kernel: tpu_custom_call.1
= control target key start
LH: loop header
LB: loop body
LE: loop exit
PB: predicated region body
PF: predicated region fallthrough
CT: control target
= control target key end

     0   :  { %s1343_s12 = smov 0   ;;  %s1345_s13 = smov 0   ;;  %s1588_s0 = inlined_call_operand.vmem [shape: f32[2,4,11,8], index: 0, kind: input, shape index: {}]   ;;  %s1589_s1 = inlined_call_operand.vmem [shape: f32[3,32,32], index: 1, kind: input, shape index: {}]   ;;  %s1590_s2 = inlined_call_operand.vmem [shape: f32[3,32,1], index: 2, kind: input, shape index: {}]   ;;  %s1591_s3 = inlined_call_operand.vmem [shape: f32[2,24,8], index: 3, kind: output, shape index: {}]  }
   0x1   :  { %s1347_s14 = smov 0  }
   0x2 LB: > { %s25_s15 = sadd.s32 1, %s1315_s13  ;;  %p1085_p0 = scmp.ge.s32.totalorder %s1319_s14, 1  ;;  %s1319_s14 = sphi %s1347_s14, %s13_s14   ;;  %s1315_s13 = sphi %s1345_s13, %s1593_s13   ;;  %s1311_s12 = sphi %s1343_s12, %s1592_s12  }
   0x3   : > { %p27_p1 = scmp.ge.s32.totalorder %s25_s15, 2  ;;  %p156_p2 = scmp.lt.s32.totalorder %s1319_s14, 3 }
   0x5   : > { %s1595_s15 = smov (%p27_p1, %s25_s15), 0  ;;  %p157_p3 = pnand %p1085_p0, %p156_p2 }
   0x6   : > { %p186_p4 = scmp.lt.s32.totalorder (!%p157_p3), %s1311_s12, 1  ;;  %vm265_vm0 = vcmask (!%p157_p3), 1044480   ;;  %v203_v0 = vld [vmem:[%s1589_s1] sm:$0xff] (!%p157_p3)  ;;  %v204_v1 = vld [vmem:[%s1589_s1 + $0x8] sm:$0xff] (!%p157_p3)  ;;  %vm258_vm1 = vcmask (!%p157_p3), 89088   ;;  %v1321_v4 = vmov (!%p157_p3), 0  }
   0x7   : > { %160 = sbr.rel (%p157_p3) target bundleno = 1417 (0x589), region = 32  ;;  %v1367_v2 = vpack.c.bf16 (!%p157_p3), %v204_v1, %v203_v0  ;;  %v222_v3 = vld [vmem:[%s1590_s2] sm:$0xff] (!%p157_p3)  ;;  %1295 = vset.pattern.permute.xlu0 (!%p157_p3), %v1321_v4  ;;  %1296 = vset.pattern.permute.xlu1 (!%p157_p3), %v1321_v4  ;;  %v224_v5 = vld [vmem:[%s1590_s2 + $0x10] sm:$0xff] (!%p157_p3)  ;;  %vm266_vm2 = vcmask (!%p157_p3), 1045504   ;;  %v1322_v6 = vmov (!%p157_p3), 65535   ;;  %v223_v8 = vld [vmem:[%s1590_s2 + $0x8] sm:$0xff] (!%p157_p3) }
   0x8   : > { %v267_v7 = vsel (!%p157_p3), %vm265_vm0, 4294967295, %v1322_v6  ;;  %240 = vperm.xlu0 (!%p157_p3), %1295, %v222_v3   ;;  %250 = vperm.xlu1 (!%p157_p3), %1296, %v224_v5   ;;  %v225_v9 = vld [vmem:[%s1590_s2 + $0x18] sm:$0xff] (!%p157_p3)  ;;  %v205_v14 = vld [vmem:[%s1589_s1 + $0x10] sm:$0xff] (!%p157_p3)  ;;  %v1096_v16 = vld [vmem:[%s1590_s2 + $0x20] sm:$0xff] (!%p157_p3)  ;;  %vm347_vm3 = vcmask (!%p157_p3), 261120   ;;  %vm994_vm4 = vcmask (!%p157_p3), 64512  }
   0x9   : > { %1182 = vmatprep.mubr.msk.bf16.mxu0 (!%p157_p3), %vm258_vm1, %v1367_v2  ;;  %v1393_v12 = vsel (!%p157_p3), %vm266_vm2, %v267_v7, 0  ;;  %v206_v15 = vld [vmem:[%s1589_s1 + $0x18] sm:$0xff] (!%p157_p3)  ;;  %v1097_v18 = vld [vmem:[%s1590_s2 + $0x28] sm:$0xff] (!%p157_p3)  ;;  %v1098_v20 = vld [vmem:[%s1590_s2 + $0x30] sm:$0xff] (!%p157_p3) }
   0xa   : > { %v1408_v19 = vpack.c.bf16 (!%p157_p3), %v206_v15, %v205_v14  ;;  %v1099_v21 = vld [vmem:[%s1590_s2 + $0x38] sm:$0xff] (!%p157_p3)  ;;  %v1100_v22 = vld [vmem:[%s1590_s2 + $0x40] sm:$0xff] (!%p157_p3)  ;;  %v1101_v23 = vld [vmem:[%s1590_s2 + $0x48] sm:$0xff] (!%p157_p3) }
   0xb   : > { %v1102_v24 = vld [vmem:[%s1590_s2 + $0x50] sm:$0xff] (!%p157_p3)  ;;  %v1089_v25 = vld [vmem:[%s1589_s1 + $0x20] sm:$0xff] (!%p157_p3)  ;;  %v1090_v26 = vld [vmem:[%s1589_s1 + $0x28] sm:$0xff] (!%p157_p3) }
   0xc   : > { %245 = vperm.xlu0 (!%p157_p3), %1295, %v223_v8   ;;  %255 = vperm.xlu1 (!%p157_p3), %1296, %v225_v9   ;;  %v1433_v27 = vpack.c.bf16 (!%p157_p3), %v1090_v26, %v1089_v25  ;;  %v1091_v49 = vld [vmem:[%s1589_s1 + $0x30] sm:$0xff] (!%p157_p3)  ;;  %v1092_v50 = vld [vmem:[%s1589_s1 + $0x38] sm:$0xff] (!%p157_p3)  ;;  %v1093_v53 = vld [vmem:[%s1589_s1 + $0x40] sm:$0xff] (!%p157_p3) }
   0xd   : > { %v1458_v52 = vpack.c.bf16 (!%p157_p3), %v1092_v50, %v1091_v49  ;;  %v1094_v54 = vld [vmem:[%s1589_s1 + $0x48] sm:$0xff] (!%p157_p3) }
   0xe   : > { %s1597_s12 = smov (!%p186_p4, %s1311_s12), 1  ;;  %1190 = vmatprep.mubr.msk.bf16.mxu1 %vm347_vm3, %v1433_v27  ;;  %v1472_v55 = vpack.c.bf16 %v1094_v54, %v1093_v53 }
   0xf   : > { %s1135_s24 = sshll.u32 %s1597_s12, 6 }
  0x10   : > { %s1386_s29 = scalar_lea.vmem %s1588_s0, %s1135_s24  ;;  %329 = vperm.xlu0 %1295, %v1096_v16   ;;  %334 = vperm.xlu1 %1296, %v1097_v18  }
  0x11   : > { %v235_v10 = vld [vmem:[%s1386_s29] sm:$0xff]  ;;  %v236_v11 = vld [vmem:[%s1386_s29 + $0x8] sm:$0x7]  ;;  %v1109_v42 = vld [vmem:[%s1386_s29 + $0x10] sm:$0xff] }
  0x12   : > { %v237_v13 = vpack.c.bf16 %v236_v11, %v235_v10  ;;  %v1110_v43 = vld [vmem:[%s1386_s29 + $0x18] sm:$0x7]  ;;  %v1118_v25 = vld [vmem:[%s1386_s29 + $0x28] sm:$0x7] }
  0x13   : > { %v484_v48 = vpack.c.bf16 %v1110_v43, %v1109_v42 }
  0x14   : > { %v270_v17 = vand.u32 %v1393_v12, %v237_v13  ;;  %339 = vperm.xlu0 %1295, %v1098_v20   ;;  %344 = vperm.xlu1 %1296, %v1099_v21   ;;  %v1095_v20 = vld [vmem:[%s1589_s1 + $0x50] sm:$0xff] }
  0x15   : > { %v486_v51 = vand.u32 %v484_v48, %v1393_v12 }
  0x16   : > { %1180 = vmatprep.subr.bf16.mxu0 %v270_v17 }
  0x17   : > { %1181 = vmatpush3.bf16.msra.mxu0 %v270_v17 }
  0x18   : > { %411 = vperm.xlu0 %1295, %v1100_v22   ;;  %416 = vperm.xlu1 %1296, %v1101_v23  }
  0x1a   : > { %1183 = vmatmul.mubr.msk.bf16.vlgmr.msra.gmra.mrb[0].mxu0 %vm258_vm1, %v1408_v19 }
  0x1b   : > { %1198 = vmatprep.mubr.msk.bf16.mxu0 %vm347_vm3, %v1472_v55 }
  0x1c   : > { %421 = vperm.xlu0 %1295, %v1102_v24   ;;  %v1117_v24 = vld [vmem:[%s1386_s29 + $0x20] sm:$0xff] }
  0x87   : > { %v1437_v28 = vpop.permute.xlu1 %250  ;;  %v1439_v29 = vpop.permute.xlu0 %240 }
  0x8b   : > { %v1442_v33 = vpop.permute.xlu1 %255  ;;  %v1445_v36 = vpop.permute.xlu0 %245 }
  0x8f   : > { %v1478_v56 = vpop.permute.xlu0 %329  ;;  %v1480_v57 = vpop.permute.xlu1 %334 }
  0x93   : > { %v1482_v58 = vpop.permute.xlu0 %339  ;;  %v1485_v62 = vpop.permute.xlu1 %344 }
  0xed   : > { %v1184_v30 = vpop.f32.mrb[0].mxu0 }
  0xee   : > { %v315_v31 = vadd.f32 %v1184_v30, %v1437_v28  ;;  %v306_v32 = vpop.f32.mrb[1].mxu0 }
  0xef   : > { %v307_v34 = vadd.f32 %v306_v32, %v1439_v29  ;;  %v1185_v35 = vpop.f32.mrb[2].mxu0 }
  0xf0   : > { %v318_v37 = vadd.f32 %v1185_v35, %v1442_v33  ;;  %v309_v38 = vpop.f32.mrb[3].mxu0  ;;  %v323_v40 = vmax.f32 %v315_v31, 0.0  ;;  %v1499_v31 = vpack.c.bf16 %v1095_v20, %v1095_v20  ;;  %v655_v35 = vpack.c.bf16 %v1118_v25, %v1117_v24 }
  0xf1   : > { %v310_v39 = vadd.f32 %v309_v38, %v1445_v36  ;;  %v321_v44 = vmax.f32 %v307_v34, 0.0 }
  0xf2   : > { %v324_v41 = vmax.f32 %v318_v37, 0.0  ;;  %v657_v37 = vand.u32 %v655_v35, %v1393_v12 }
  0xf3   : > { %v322_v45 = vmax.f32 %v310_v39, 0.0 }
  0xf4   : > { %v326_v46 = vpack.c.bf16 %v324_v41, %v323_v40 }
  0xf5   : > { %v325_v47 = vpack.c.bf16 %v322_v45, %v321_v44 }
  0xf7   : > { %1186 = vmatprep.subr.bf16.mxu1 %v325_v47 }
  0xf8   : > { %1187 = vmatpush3.bf16.msra.mxu1 %v325_v47 }
  0xf9   : > { %1188 = vmatprep.subr.bf16.mxu1 %v326_v46 }
  0xfc   : > { %1189 = vmatpush3.bf16.msra.mxu1 %v326_v46 }
  0xfd   : > { %1202 = vmatprep.subr.bf16.mxu1 %v486_v51 }
  0xff   : > { %1191 = vmatmul.mubr.msk.bf16.vlgmr.msra.gmra.mrb[0].mxu1 %vm347_vm3, %v1458_v52 }
 0x100   : > { %1203 = vmatpush3.bf16.msra.mxu1 %v486_v51  ;;  %1204 = vmatprep.mubr.msk.bf16.mxu1 %vm258_vm1, %v1367_v2 }
 0x107   : > { %1205 = vmatmul.mubr.msk.bf16.vlgmr.msra.gmra.mrb[4].mxu1 %vm258_vm1, %v1408_v19 }
 0x108   : > { %1220 = vmatprep.mubr.msk.bf16.mxu1 %vm347_vm3, %v1472_v55 }
 0x1d2   : > { %v1192_v59 = vpop.f32.mrb[0].mxu1 }
 0x1d3   : > { %v397_v60 = vadd.f32 %v1192_v59, %v1482_v58  ;;  %v388_v61 = vpop.f32.mrb[1].mxu1 }
 0x1d4   : > { %v389_v63 = vadd.f32 %v388_v61, %v1478_v56  ;;  %v1193_v0 = vpop.f32.mrb[2].mxu1 }
 0x1d5   : > { %v400_v1 = vadd.f32 %v1193_v0, %v1485_v62  ;;  %v391_v3 = vpop.f32.mrb[3].mxu1  ;;  %v405_v5 = vmax.f32 %v397_v60, 0.0 }
 0x1d6   : > { %v392_v4 = vadd.f32 %v391_v3, %v1480_v57  ;;  %v403_v7 = vmax.f32 %v389_v63, 0.0 }
 0x1d7   : > { %v406_v6 = vmax.f32 %v400_v1, 0.0 }
 0x1d8   : > { %v404_v8 = vmax.f32 %v392_v4, 0.0 }
 0x1d9   : > { %v408_v9 = vpack.c.bf16 %v406_v6, %v405_v5 }
 0x1da   : > { %v407_v10 = vpack.c.bf16 %v404_v8, %v403_v7  ;;  %v1206_v11 = vpop.f32.mrb[4].mxu1 }
 0x1db   : > { %v531_v13 = vadd.f32 %v1206_v11, %v1437_v28  ;;  %v522_v14 = vpop.f32.mrb[5].mxu1 }
 0x1dc   : > { %v523_v15 = vadd.f32 %v522_v14, %v1439_v29  ;;  %1194 = vmatprep.subr.bf16.mxu0 %v407_v10  ;;  %v1207_v16 = vpop.f32.mrb[6].mxu1 }
 0x1dd   : > { %v534_v17 = vadd.f32 %v1207_v16, %v1442_v33  ;;  %1195 = vmatpush3.bf16.msra.mxu0 %v407_v10  ;;  %v525_v18 = vpop.f32.mrb[7].mxu1  ;;  %v539_v22 = vmax.f32 %v531_v13, 0.0  ;;  %v1126_v10 = vld [vmem:[%s1386_s29 + $0x38] sm:$0x7] }
 0x1de   : > { %v526_v21 = vadd.f32 %v525_v18, %v1445_v36  ;;  %1196 = vmatprep.subr.bf16.mxu0 %v408_v9  ;;  %v537_v26 = vmax.f32 %v523_v15, 0.0  ;;  %v1537_v18 = vpop.permute.xlu0 %411 }
 0x1df   : > { %v540_v23 = vmax.f32 %v534_v17, 0.0 }
 0x1e0   : > { %v538_v30 = vmax.f32 %v526_v21, 0.0 }
 0x1e1   : > { %v542_v32 = vpack.c.bf16 %v540_v23, %v539_v22  ;;  %1197 = vmatpush3.bf16.msra.mxu0 %v408_v9  ;;  %v1125_v9 = vld [vmem:[%s1386_s29 + $0x30] sm:$0xff]  ;;  %v1543_v23 = vpop.permute.xlu1 %416  ;;  %s1268_s29 = smul.u32 24, %s1597_s12 }
 0x1e2   : > { %v541_v34 = vpack.c.bf16 %v538_v30, %v537_v26  ;;  %v826_v16 = vpack.c.bf16 %v1126_v10, %v1125_v9  ;;  %v1539_v20 = vpop.permute.xlu0 %421 }
 0x1e3   : > { %s201_s21 = scalar_lea.vmem %s1591_s3, %s1268_s29 }
 0x1e4   : > { %1199 = vmatmul.mubr.msk.bf16.vlgmr.msra.gmra.mrb[4].mxu0 %vm347_vm3, %v1499_v31  ;;  %1208 = vmatprep.subr.bf16.mxu0 %v541_v34  ;;  %v828_v17 = vand.u32 %v826_v16, %v1393_v12 }
 0x1e5   : > { %1209 = vmatpush3.bf16.msra.mxu0 %v541_v34  ;;  %1212 = vmatprep.mubr.msk.bf16.mxu0 %vm347_vm3, %v1433_v27 }
 0x1e6   : > { %1210 = vmatprep.subr.bf16.mxu0 %v542_v32 }
 0x1e9   : > { %1211 = vmatpush3.bf16.msra.mxu0 %v542_v32 }
 0x1ea   : > { %1224 = vmatprep.subr.bf16.mxu0 %v657_v37 }
 0x1ec   : > { %1213 = vmatmul.mubr.msk.bf16.vlgmr.msra.gmra.mrb[8].mxu0 %vm347_vm3, %v1458_v52 }
 0x1ed   : > { %1225 = vmatpush3.bf16.msra.mxu0 %v657_v37  ;;  %1226 = vmatprep.mubr.msk.bf16.mxu0 %vm258_vm1, %v1367_v2 }
 0x1f4   : > { %1227 = vmatmul.mubr.msk.bf16.vlgmr.msra.gmra.mrb[12].mxu0 %vm258_vm1, %v1408_v19 }
 0x1f5   : > { %1242 = vmatprep.mubr.msk.bf16.mxu0 %vm347_vm3, %v1472_v55 }
 0x2b7   : > { %v1200_v38 = vpop.f32.mrb[4].mxu0 }
 0x2b8   : > { %v464_v39 = vpop.f32.mrb[5].mxu0  ;;  %v473_v12 = vadd.f32 %v1200_v38, %v1539_v20 }
 0x2b9   : > { %v1201_v40 = vpop.f32.mrb[6].mxu0  ;;  %v465_v21 = vadd.f32 %v464_v39, %v1537_v18 }
 0x2ba   : > { %v467_v41 = vpop.f32.mrb[7].mxu0 }
 0x2bb   : > { %v468_v25 = vadd.f32 %v467_v41, %v1543_v23  ;;  %v478_v34 = vmax.f32 %v465_v21, 0.0 }
 0x2bd   : > { %v479_v39 = vmax.f32 %v468_v25, 0.0 }
 0x2bf   : > { %v1214_v42 = vpop.f32.mrb[8].mxu0 }
 0x2c0   : > { %v586_v43 = vadd.f32 %v1214_v42, %v1482_v58  ;;  %v577_v44 = vpop.f32.mrb[9].mxu0 }
 0x2c1   : > { %v578_v45 = vadd.f32 %v577_v44, %v1478_v56  ;;  %v1215_v46 = vpop.f32.mrb[10].mxu0 }
 0x2c2   : > { %v589_v47 = vadd.f32 %v1215_v46, %v1485_v62  ;;  %v580_v48 = vpop.f32.mrb[11].mxu0  ;;  %v594_v50 = vmax.f32 %v586_v43, 0.0 }
 0x2c3   : > { %v581_v49 = vadd.f32 %v580_v48, %v1480_v57  ;;  %v592_v53 = vmax.f32 %v578_v45, 0.0 }
 0x2c4   : > { %v595_v51 = vmax.f32 %v589_v47, 0.0 }
 0x2c5   : > { %v593_v54 = vmax.f32 %v581_v49, 0.0 }
 0x2c6   : > { %v597_v59 = vpack.c.bf16 %v595_v51, %v594_v50 }
 0x2c7   : > { %v596_v60 = vpack.c.bf16 %v593_v54, %v592_v53  ;;  %v1228_v61 = vpop.f32.mrb[12].mxu0 }
 0x2c8   : > { %v702_v63 = vadd.f32 %v1228_v61, %v1437_v28  ;;  %v693_v0 = vpop.f32.mrb[13].mxu0 }
 0x2c9   : > { %v694_v1 = vadd.f32 %v693_v0, %v1439_v29  ;;  %1216 = vmatprep.subr.bf16.mxu1 %v596_v60  ;;  %v1229_v3 = vpop.f32.mrb[14].mxu0 }
 0x2ca   : > { %v705_v4 = vadd.f32 %v1229_v3, %v1442_v33  ;;  %1217 = vmatpush3.bf16.msra.mxu1 %v596_v60  ;;  %v696_v5 = vpop.f32.mrb[15].mxu0  ;;  %v710_v7 = vmax.f32 %v702_v63, 0.0 }
 0x2cb   : > { %v697_v6 = vadd.f32 %v696_v5, %v1445_v36  ;;  %1218 = vmatprep.subr.bf16.mxu1 %v597_v59  ;;  %v708_v11 = vmax.f32 %v694_v1, 0.0 }
 0x2cc   : > { %v711_v8 = vmax.f32 %v705_v4, 0.0 }
 0x2cd   : > { %v709_v13 = vmax.f32 %v697_v6, 0.0 }
 0x2ce   : > { %v713_v14 = vpack.c.bf16 %v711_v8, %v710_v7  ;;  %1219 = vmatpush3.bf16.msra.mxu1 %v597_v59 }
 0x2cf   : > { %v712_v15 = vpack.c.bf16 %v709_v13, %v708_v11 }
 0x2d1   : > { %1221 = vmatmul.mubr.msk.bf16.vlgmr.msra.gmra.mrb[8].mxu1 %vm347_vm3, %v1499_v31  ;;  %1230 = vmatprep.subr.bf16.mxu1 %v712_v15 }
 0x2d2   : > { %1231 = vmatpush3.bf16.msra.mxu1 %v712_v15  ;;  %1234 = vmatprep.mubr.msk.bf16.mxu1 %vm347_vm3, %v1433_v27 }
 0x2d3   : > { %1232 = vmatprep.subr.bf16.mxu1 %v713_v14 }
 0x2d6   : > { %1233 = vmatpush3.bf16.msra.mxu1 %v713_v14 }
 0x2d7   : > { %1246 = vmatprep.subr.bf16.mxu1 %v828_v17 }
 0x2d9   : > { %1235 = vmatmul.mubr.msk.bf16.vlgmr.msra.gmra.mrb[12].mxu1 %vm347_vm3, %v1458_v52 }
 0x2da   : > { %1247 = vmatpush3.bf16.msra.mxu1 %v828_v17  ;;  %1248 = vmatprep.mubr.msk.bf16.mxu1 %vm258_vm1, %v1367_v2 }
 0x2e1   : > { %1249 = vmatmul.mubr.msk.bf16.vlgmr.msra.gmra.mrb[16].mxu1 %vm258_vm1, %v1408_v19 }
 0x2e2   : > { %1264 = vmatprep.mubr.msk.bf16.mxu1 %vm347_vm3, %v1472_v55  ;;  %v480_v55 = vmax.f32 %v473_v12, 0.0 }
 0x3a4   : > { %v1222_v22 = vpop.f32.mrb[8].mxu1 }
 0x3a5   : > { %v641_v24 = vadd.f32 %v1222_v22, %v1539_v20  ;;  %v632_v2 = vpop.f32.mrb[9].mxu1 }
 0x3a6   : > { %v633_v19 = vadd.f32 %v632_v2, %v1537_v18  ;;  %v1223_v26 = vpop.f32.mrb[10].mxu1 }
 0x3a7   : > { %v648_v30 = vmax.f32 %v641_v24, 0.0  ;;  %v635_v32 = vpop.f32.mrb[11].mxu1 }
 0x3a8   : > { %v646_v35 = vmax.f32 %v633_v19, 0.0  ;;  %v636_v37 = vadd.f32 %v635_v32, %v1543_v23 }
 0x3a9   : > { %v651_v38 = vmax.f32 %v480_v55, %v648_v30 }
 0x3aa   : > { %v649_v40 = vmax.f32 %v478_v34, %v646_v35  ;;  %v647_v42 = vmax.f32 %v636_v37, 0.0 }
 0x3ac   : > { %v650_v43 = vmax.f32 %v479_v39, %v647_v42  ;;  %v1236_v44 = vpop.f32.mrb[12].mxu1 }
 0x3ad   : > { %v757_v45 = vadd.f32 %v1236_v44, %v1482_v58  ;;  %v748_v46 = vpop.f32.mrb[13].mxu1 }
 0x3ae   : > { %v749_v41 = vadd.f32 %v748_v46, %v1478_v56  ;;  %v1237_v47 = vpop.f32.mrb[14].mxu1 }
 0x3af   : > { %v760_v48 = vadd.f32 %v1237_v47, %v1485_v62  ;;  %v751_v49 = vpop.f32.mrb[15].mxu1  ;;  %v765_v51 = vmax.f32 %v757_v45, 0.0 }
 0x3b0   : > { %v752_v50 = vadd.f32 %v751_v49, %v1480_v57  ;;  %v763_v54 = vmax.f32 %v749_v41, 0.0 }
 0x3b1   : > { %v766_v53 = vmax.f32 %v760_v48, 0.0 }
 0x3b2   : > { %v764_v59 = vmax.f32 %v752_v50, 0.0 }
 0x3b3   : > { %v768_v60 = vpack.c.bf16 %v766_v53, %v765_v51 }
 0x3b4   : > { %v767_v61 = vpack.c.bf16 %v764_v59, %v763_v54  ;;  %v1250_v63 = vpop.f32.mrb[16].mxu1 }
 0x3b5   : > { %v873_v0 = vadd.f32 %v1250_v63, %v1437_v28  ;;  %v864_v1 = vpop.f32.mrb[17].mxu1 }
 0x3b6   : > { %v865_v3 = vadd.f32 %v864_v1, %v1439_v29  ;;  %1238 = vmatprep.subr.bf16.mxu0 %v767_v61  ;;  %v1251_v4 = vpop.f32.mrb[18].mxu1 }
 0x3b7   : > { %v876_v5 = vadd.f32 %v1251_v4, %v1442_v33  ;;  %1239 = vmatpush3.bf16.msra.mxu0 %v767_v61  ;;  %v867_v6 = vpop.f32.mrb[19].mxu1  ;;  %v881_v8 = vmax.f32 %v873_v0, 0.0 }
 0x3b8   : > { %v868_v7 = vadd.f32 %v867_v6, %v1445_v36  ;;  %1240 = vmatprep.subr.bf16.mxu0 %v768_v60  ;;  %v879_v10 = vmax.f32 %v865_v3, 0.0 }
 0x3b9   : > { %v882_v9 = vmax.f32 %v876_v5, 0.0 }
 0x3ba   : > { %v880_v11 = vmax.f32 %v868_v7, 0.0 }
 0x3bb   : > { %v884_v13 = vpack.c.bf16 %v882_v9, %v881_v8  ;;  %1241 = vmatpush3.bf16.msra.mxu0 %v768_v60 }
 0x3bc   : > { %v883_v14 = vpack.c.bf16 %v880_v11, %v879_v10 }
 0x3be   : > { %1243 = vmatmul.mubr.msk.bf16.vlgmr.msra.gmra.mrb[16].mxu0 %vm347_vm3, %v1499_v31  ;;  %1252 = vmatprep.subr.bf16.mxu0 %v883_v14 }
 0x3bf   : > { %1253 = vmatpush3.bf16.msra.mxu0 %v883_v14  ;;  %1256 = vmatprep.mubr.msk.bf16.mxu0 %vm347_vm3, %v1433_v27 }
 0x3c0   : > { %1254 = vmatprep.subr.bf16.mxu0 %v884_v13 }
 0x3c3   : > { %1255 = vmatpush3.bf16.msra.mxu0 %v884_v13 }
 0x3c6   : > { %1257 = vmatmul.mubr.msk.bf16.vlgmr.msra.gmra.mrb[20].mxu0 %vm347_vm3, %v1458_v52 }
 0x491   : > { %v1244_v28 = vpop.f32.mrb[16].mxu0 }
 0x492   : > { %v812_v29 = vadd.f32 %v1244_v28, %v1539_v20  ;;  %v803_v33 = vpop.f32.mrb[17].mxu0 }
 0x493   : > { %v804_v36 = vadd.f32 %v803_v33, %v1537_v18  ;;  %v1245_v15 = vpop.f32.mrb[18].mxu0 }
 0x494   : > { %v819_v16 = vmax.f32 %v812_v29, 0.0  ;;  %v806_v17 = vpop.f32.mrb[19].mxu0 }
 0x495   : > { %v817_v12 = vmax.f32 %v804_v36, 0.0  ;;  %v807_v21 = vadd.f32 %v806_v17, %v1543_v23 }
 0x496   : > { %v822_v22 = vmax.f32 %v651_v38, %v819_v16 }
 0x497   : > { %v820_v24 = vmax.f32 %v649_v40, %v817_v12  ;;  %v818_v27 = vmax.f32 %v807_v21, 0.0 }
 0x499   : > { %v821_v2 = vmax.f32 %v650_v43, %v818_v27  ;;  %v1258_v25 = vpop.f32.mrb[20].mxu0 }
 0x49a   : > { %v928_v19 = vadd.f32 %v1258_v25, %v1482_v58  ;;  %v919_v52 = vpop.f32.mrb[21].mxu0 }
 0x49b   : > { %v920_v26 = vadd.f32 %v919_v52, %v1478_v56  ;;  %v1259_v55 = vpop.f32.mrb[22].mxu0 }
 0x49c   : > { %v931_v30 = vadd.f32 %v1259_v55, %v1485_v62  ;;  %v922_v32 = vpop.f32.mrb[23].mxu0  ;;  %v936_v35 = vmax.f32 %v928_v19, 0.0 }
 0x49d   : > { %v923_v34 = vadd.f32 %v922_v32, %v1480_v57  ;;  %v934_v39 = vmax.f32 %v920_v26, 0.0 }
 0x49e   : > { %v937_v37 = vmax.f32 %v931_v30, 0.0 }
 0x49f   : > { %v935_v38 = vmax.f32 %v923_v34, 0.0 }
 0x4a0   : > { %v939_v40 = vpack.c.bf16 %v937_v37, %v936_v35 }
 0x4a1   : > { %v938_v42 = vpack.c.bf16 %v935_v38, %v934_v39 }
 0x4a3   : > { %1260 = vmatprep.subr.bf16.mxu1 %v938_v42 }
 0x4a4   : > { %1261 = vmatpush3.bf16.msra.mxu1 %v938_v42 }
 0x4a5   : > { %1262 = vmatprep.subr.bf16.mxu1 %v939_v40 }
 0x4a8   : > { %1263 = vmatpush3.bf16.msra.mxu1 %v939_v40 }
 0x4ab   : > { %1265 = vmatmul.mubr.msk.bf16.vlgmr.msra.gmra.mrb[20].mxu1 %vm347_vm3, %v1499_v31 }
 0x57e   : > { %v1266_v56 = vpop.f32.mrb[20].mxu1 }
 0x57f   : > { %v983_v58 = vadd.f32 %v1266_v56, %v1539_v20  ;;  %v974_v62 = vpop.f32.mrb[21].mxu1 }
 0x580   : > { %v975_v57 = vadd.f32 %v974_v62, %v1537_v18  ;;  %v1267_v43 = vpop.f32.mrb[22].mxu1 }
 0x581   : > { %v990_v44 = vmax.f32 %v983_v58, 0.0  ;;  %v977_v45 = vpop.f32.mrb[23].mxu1 }
 0x582   : > { %v988_v46 = vmax.f32 %v975_v57, 0.0  ;;  %v978_v41 = vadd.f32 %v977_v45, %v1543_v23 }
 0x583   : > { %v993_v47 = vmax.f32 %v822_v22, %v990_v44 }
 0x584   : > { %v991_v31 = vmax.f32 %v820_v24, %v988_v46  ;;  %v989_v48 = vmax.f32 %v978_v41, 0.0 }
 0x585   : > { %997 = vst.msk [vmem:[%s201_s21 + $0x10] sm:$0xff] %vm994_vm4, %v993_v47 }
 0x586   : > { %995 = vst.msk [vmem:[%s201_s21] sm:$0xff] %vm994_vm4, %v991_v31  ;;  %v992_v20 = vmax.f32 %v821_v2, %v989_v48 }
 0x588   : > { %996 = vst.msk [vmem:[%s201_s21 + $0x8] sm:$0xff] %vm994_vm4, %v992_v20 }
 0x589 PF: > { %s13_s14 = sadd.s32 1, %s1319_s14   ;;  %s1592_s12 = smov %s1315_s13 }
 0x58a   : > { %p10_p5 = scmp.ge.s32.totalorder %s13_s14, 4   ;;  %s1593_s13 = smov %s1595_s15 }
 0x58c   :  { %12 = sbr.rel (!%p10_p5) target bundleno = 2 (0x2), region = 69 }

</bundles_post_ra>
